<compile_context>
chip_gen: v7x
topology: tpu7x:2x2x1
jax: 0.10.0
libtpu: 0.0.40
codegen_flags: <defaults>
</compile_context>

<pallas_src>
import jax
import jax.numpy as jnp
from jax.experimental import pallas as pl
from jax.experimental.pallas import tpu as pltpu


def _hierarchy2_back_kernel(goal_norm_ref, goal_up_ref, w_ref, out_ref):
    goal_norm = goal_norm_ref[...]
    goal_up = goal_up_ref[...]
    w = w_ref[...]                      # PyTorch (out, in) layout, untransposed.

    batch = goal_norm_ref.shape[0]

    # Linear (no bias): goal_up @ W.T, expressed as a contraction over dim 1
    # of both operands so no transpose HLO or in-kernel relayout is needed.
    goal = jax.lax.dot_general(
        goal_up,
        w,
        dimension_numbers=(((1,), (1,)), ((), ())),
        preferred_element_type=jnp.float32,
    )
    goal = goal + goal_norm

    # Fused global min/max: one cross-lane XLU reduce over [goal; -goal]
    # stacked along the (mostly empty) sublane axis, then two tiny (B,1)
    # sublane reduces to split the halves.
    both = jnp.concatenate([goal, -goal], axis=0)          # (2B, H)
    row_ext = jnp.max(both, axis=1, keepdims=True)         # (2B, 1)
    maximum = jnp.max(row_ext[:batch], axis=0, keepdims=True)    # (1, 1) = max(goal)
    minimum = -jnp.max(row_ext[batch:], axis=0, keepdims=True)   # (1, 1) = min(goal)

    # Scalar exact reciprocal, then a broadcast multiply on the vector path.
    inv = 1.0 / (maximum - minimum + 1e-9)                 # (1, 1)
    out = (goal - minimum) * inv

    out_ref[...] = out.astype(out_ref.dtype)


def hierarchy2_back_forward(goal_norm, goal_up, weight):
    """Pallas implementation of Hierarchy2_back.forward.

    Args:
      goal_norm: (batch, hidden) array.
      goal_up:   (batch, hidden) array.
      weight:    (hidden, hidden) nn.Linear weight in PyTorch (out, in) layout.

    Note: the output aliases goal_norm's buffer (input_output_aliases); to get
    the zero-copy benefit the caller should donate goal_norm and not reuse it.
    """
    assert goal_norm.shape == goal_up.shape
    assert weight.shape == (goal_up.shape[1], goal_up.shape[1])

    vmem = pl.BlockSpec(memory_space=pltpu.MemorySpace.VMEM)

    return pl.pallas_call(
        _hierarchy2_back_kernel,
        in_specs=[vmem, vmem, vmem],
        out_specs=vmem,
        out_shape=jax.ShapeDtypeStruct(goal_norm.shape, goal_norm.dtype),
        input_output_aliases={0: 0},
    )(goal_norm, goal_up, weight)


def hierarchy2_back_ref(goal_norm, goal_up, weight):
    """Pure-JAX reference (mirrors the PyTorch forward)."""
    goal = jnp.dot(goal_up, weight.T) + goal_norm
    minimum = goal.min()
    maximum = goal.max()
    return (goal - minimum) / (maximum - minimum + 1e-9)


if __name__ == "__main__":
    batch = 2
    hidden_dim = 32

    key = jax.random.PRNGKey(0)
    k_norm, k_up, k_w = jax.random.split(key, 3)

    goal_norm = jax.random.normal(k_norm, (batch, hidden_dim), dtype=jnp.float32)
    goal_up = jax.random.normal(k_up, (batch, hidden_dim), dtype=jnp.float32)
    # nn.Linear default init scale ~ 1/sqrt(hidden); exact init is irrelevant
    # for checking forward semantics, so use a small random weight.
    weight = jax.random.normal(k_w, (hidden_dim, hidden_dim), dtype=jnp.float32)
    weight = weight * (1.0 / jnp.sqrt(hidden_dim))

    # Compute the reference first: the kernel's output aliases goal_norm's
    # buffer, so goal_norm should not be relied upon after the kernel runs.
    ref = hierarchy2_back_ref(goal_norm, goal_up, weight)

    out = hierarchy2_back_forward(goal_norm, goal_up, weight)
    out = jax.block_until_ready(out)

    assert out.shape == ref.shape
    assert jnp.allclose(out, ref, atol=1e-6, rtol=1e-6), "mismatch vs reference"

    print("KERNEL_OK")
</pallas_src>

<mosaic_0001>
module attributes {stable_mosaic.version = 11 : i64} {
  func.func @_hierarchy2_back_kernel(%arg0: memref<2x32xf32, #tpu.memory_space<vmem>>, %arg1: memref<2x32xf32, #tpu.memory_space<vmem>>, %arg2: memref<32x32xf32, #tpu.memory_space<vmem>>, %arg3: memref<2x32xf32, #tpu.memory_space<vmem>>) attributes {dimension_semantics = [], scalar_prefetch = 0 : i64, scratch_operands = 0 : i64, tpu.core_type = #tpu.core_type<tc>} {
    %c0 = arith.constant 0 : index
    %c0_0 = arith.constant 0 : index
    %0 = vector.load %arg0[%c0, %c0_0] : memref<2x32xf32, #tpu.memory_space<vmem>>, vector<2x32xf32>
    %c0_1 = arith.constant 0 : index
    %c0_2 = arith.constant 0 : index
    %1 = vector.load %arg1[%c0_1, %c0_2] : memref<2x32xf32, #tpu.memory_space<vmem>>, vector<2x32xf32>
    %c0_3 = arith.constant 0 : index
    %c0_4 = arith.constant 0 : index
    %2 = vector.load %arg2[%c0_3, %c0_4] : memref<32x32xf32, #tpu.memory_space<vmem>>, vector<32x32xf32>
    %cst = arith.constant dense<0.000000e+00> : vector<2x32xf32>
    %3 = tpu.matmul %1, %2, %cst {dimension_numbers = #tpu.dot_dimension_numbers<[1], [1], [0], [0], [0, 0, 1, 0], [], []>} : vector<2x32xf32>, vector<32x32xf32>, vector<2x32xf32> -> vector<2x32xf32>
    %4 = arith.addf %3, %0 : vector<2x32xf32>
    %cst_5 = arith.constant 0.000000e+00 : f32
    %5 = vector.broadcast %cst_5 : f32 to vector<2x32xf32>
    %6 = arith.subf %5, %4 : vector<2x32xf32>
    %7 = tpu.concatenate %4, %6 in 0 : vector<2x32xf32>, vector<2x32xf32> -> vector<4x32xf32>
    %cst_6 = arith.constant dense<0xFF800000> : vector<4xf32>
    %8 = vector.multi_reduction <maximumf>, %7, %cst_6 [1] : vector<4x32xf32> to vector<4xf32>
    %9 = vector.shape_cast %8 : vector<4xf32> to vector<4x1xf32>
    %10 = vector.extract_strided_slice %9 {offsets = [0, 0], sizes = [2, 1], strides = [1, 1]} : vector<4x1xf32> to vector<2x1xf32>
    %cst_7 = arith.constant dense<0xFF800000> : vector<1xf32>
    %11 = vector.multi_reduction <maximumf>, %10, %cst_7 [0] : vector<2x1xf32> to vector<1xf32>
    %12 = vector.shape_cast %11 : vector<1xf32> to vector<1x1xf32>
    %13 = vector.extract_strided_slice %9 {offsets = [2, 0], sizes = [2, 1], strides = [1, 1]} : vector<4x1xf32> to vector<2x1xf32>
    %cst_8 = arith.constant dense<0xFF800000> : vector<1xf32>
    %14 = vector.multi_reduction <maximumf>, %13, %cst_8 [0] : vector<2x1xf32> to vector<1xf32>
    %15 = vector.shape_cast %14 : vector<1xf32> to vector<1x1xf32>
    %cst_9 = arith.constant 0.000000e+00 : f32
    %16 = vector.broadcast %cst_9 : f32 to vector<1x1xf32>
    %17 = arith.subf %16, %15 : vector<1x1xf32>
    %18 = arith.subf %12, %17 : vector<1x1xf32>
    %cst_10 = arith.constant 9.99999971E-10 : f32
    %19 = vector.broadcast %cst_10 : f32 to vector<1x1xf32>
    %20 = arith.addf %18, %19 : vector<1x1xf32>
    %cst_11 = arith.constant 1.000000e+00 : f32
    %21 = vector.broadcast %cst_11 : f32 to vector<1x1xf32>
    %22 = arith.divf %21, %20 : vector<1x1xf32>
    %23 = vector.broadcast %17 : vector<1x1xf32> to vector<2x32xf32>
    %24 = arith.subf %4, %23 : vector<2x32xf32>
    %25 = vector.broadcast %22 : vector<1x1xf32> to vector<2x32xf32>
    %26 = arith.mulf %24, %25 : vector<2x32xf32>
    %c0_12 = arith.constant 0 : index
    %c0_13 = arith.constant 0 : index
    %27 = vector.load %arg3[%c0_12, %c0_13] : memref<2x32xf32, #tpu.memory_space<vmem>>, vector<2x32xf32>
    tpu.vector_store %arg3[%c0_12, %c0_13], %26 {strides = array<i32>} : memref<2x32xf32, #tpu.memory_space<vmem>>, vector<2x32xf32>,
    return
  }
}

</mosaic_0001>

<bundles_post_ra>
// kernel: tpu_custom_call.1
= control target key start
LH: loop header
LB: loop body
LE: loop exit
PB: predicated region body
PF: predicated region fallthrough
CT: control target
= control target key end

     0   :  { %8 = vsyncpa [#allocation3], 0  ;;  %s368_s0 = inlined_call_operand.hbm [shape: f32[2,32], index: 0, kind: input, shape index: {}, may-alias: {0,3}]   ;;  %s369_s1 = inlined_call_operand.vmem [shape: f32[2,32], index: 1, kind: input, shape index: {}]   ;;  %s370_s2 = inlined_call_operand.hbm [shape: f32[32,32], index: 2, kind: input, shape index: {}]   ;;  %s371_s3 = inlined_call_operand.hbm [shape: f32[2,32], index: 3, kind: output, shape index: {}, may-alias: {0,3}]  }
   0x1   :  { %9 = vsyncpa [#allocation6], 0 }
   0x2   :  { %10 = vsyncpa [#allocation4], 0  ;;  %s294_s12 = smov [#allocation2]   ;;  %s295_s14 = smov [#allocation5]  }
   0x3   :  { %s17_s13 = sshll.u32 %s294_s12, 4  ;;  %s28_s15 = sshll.u32 %s295_s14, 4  ;;  %s18_s13 = int_to_ptr.vmem [resolvable:$true] %s17_s13  ;;  %s322_s15 = int_to_ptr.vmem [resolvable:$true] %s28_s15 }
   0x4   :  { %s222_s18 = scalar_lea.hbm %s368_s0, 32 }
   0x5   :  { %p223_p0 = scmp.ne.s32.totalorder %s368_s0, %s222_s18  ;;  %p226_p1 = scmp.lt.u32.totalorder %s222_s18, %s368_s0 }
   0x7   :  { %p228_p2 = pnand %p226_p1, %p223_p0 }
   0x9   :  { %231 = shalt.err (!%p228_p2)
}
   0xa   :  { %s232_s23 = scalar_lea.vmem %s18_s13, 32  ;;  %p237_p4 = scmp.lt.s32.totalorder %s18_s13, %s18_s13 }
   0xb   :  { %p233_p3 = scmp.ne.s32.totalorder %s18_s13, %s232_s23  ;;  %p238_p5 = scmp.lt.s32.totalorder %s232_s23, %s232_s23 }
   0xd   :  { %p239_p6 = por %p238_p5, %p237_p4 }
   0xf   :  { %p240_p7 = pnand %p239_p6, %p233_p3 }
  0x11   :  { %243 = shalt.err (!%p240_p7)
}
  0x12   :  { %20 = dma.hbm_to_vmem [thread:$0]  %s368_s0, 32, %s18_s13, [#allocation3]  }
  0x13   :  { %s244_s28 = scalar_lea.hbm %s370_s2, 512 }
  0x14   :  { %p245_p8 = scmp.ne.s32.totalorder %s370_s2, %s244_s28  ;;  %p248_p9 = scmp.lt.u32.totalorder %s244_s28, %s370_s2 }
  0x16   :  { %p250_p10 = pnand %p248_p9, %p245_p8 }
  0x18   :  { %253 = shalt.err (!%p250_p10)
}
  0x19   :  { %s254_s6 = scalar_lea.vmem %s322_s15, 512  ;;  %p259_p12 = scmp.lt.s32.totalorder %s322_s15, %s322_s15 }
  0x1a   :  { %p255_p11 = scmp.ne.s32.totalorder %s322_s15, %s254_s6  ;;  %p260_p13 = scmp.lt.s32.totalorder %s254_s6, %s254_s6 }
  0x1c   :  { %p261_p0 = por %p260_p13, %p259_p12 }
  0x1e   :  { %p262_p1 = pnand %p261_p0, %p255_p11 }
  0x20   :  { %265 = shalt.err (!%p262_p1)
}
  0x21   :  { %s296_s0 = smov 128   ;;  %s297_s7 = smov 8  }
  0x22   :  { %34 = dma.hbm_to_vmem [thread:$0]  %s370_s2, 512, %s322_s15, [#allocation6], %s296_s0, %s296_s0, %s297_s7  }
  0x23   :  { %288 = dma.done.wait [#allocation3], 32  }
  0x24   :  { %289 = vsyncadd [#allocation3], 4294967264 }
  0x25   :  { %290 = dma.done.wait [#allocation6], 512  }
  0x26   :  { %291 = vsyncadd [#allocation6], 4294966784  ;;  %v298_v0 = vmov 0.0|0.0   ;;  %vm299_vm0 = vmmov 0   ;;  %v300_v1 = vmov 0.0   ;;  %vm47_vm1 = vcmask 261120  }
  0x27   :  { %204 = vmatprep.subr.bf16.mxu0 %v298_v0  ;;  %201 = vmatprep.mubr.msk.f32.mxu0 %vm299_vm0, %v300_v1  ;;  %v43_v2 = vld [vmem:[#allocation5] sm:$0xff]  ;;  %v44_v3 = vld [vmem:[#allocation5 + $0x8] sm:$0xff]  ;;  %vm206_vm2 = vmpackc.low %vm47_vm1, %vm47_vm1  ;;  %vm137_vm3 = vcmask 1041408   ;;  %vm139_vm4 = vcmask 257024   ;;  %vm150_vm5 = vcmask 1043458   ;;  %vm165_vm6 = vcmask 254976  }
  0x28   :  { %v205_v4 = vpack.c.bf16 %v44_v3, %v43_v2  ;;  %v45_v5 = vld [vmem:[#allocation5 + $0x10] sm:$0xff]  ;;  %v46_v6 = vld [vmem:[#allocation5 + $0x18] sm:$0xff] }
  0x29   :  { %v209_v7 = vpack.c.bf16 %v46_v6, %v45_v5  ;;  %v42_v8 = vld [vmem:[%s369_s1] sm:$0x3]  ;;  %v41_v9 = vld [vmem:[#allocation2] sm:$0x3]  ;;  %s301_s1 = smov [#allocation7]  }
  0x2a   :  { %207 = vmatpush3.bf16.xpose.msk.msra.mxu0 %vm206_vm2, %v205_v4  ;;  %s173_s11 = sshll.u32 %s301_s1, 4  ;;  %s174_s11 = int_to_ptr.vmem [resolvable:$true] %s173_s11 }
  0x2b   :  { %208 = vmatprep.subr.bf16.mxu0 %v298_v0  ;;  %s266_s12 = scalar_lea.vmem %s174_s11, 32  ;;  %p271_p3 = scmp.lt.s32.totalorder %s174_s11, %s174_s11 }
  0x2c   :  { %p267_p2 = scmp.ne.s32.totalorder %s174_s11, %s266_s12  ;;  %p272_p4 = scmp.lt.s32.totalorder %s266_s12, %s266_s12 }
  0x2e   :  { %p273_p5 = por %p272_p4, %p271_p3 }
  0x30   :  { %p274_p6 = pnand %p273_p5, %p267_p2 }
  0x32   :  { %211 = vmatpush3.bf16.xpose.msk.msra.mxu0 %vm206_vm2, %v209_v7 }
  0x39   :  { %202 = vmatmul.mubr.msk.f32.vlgmr.msra.gmra.mrb[0].mxu0 %vm47_vm1, %v42_v8 }
 0x10c   :  { %v129_v10 = vpop.f32.mrb[0].mxu0 }
 0x10d   :  { %v130_v11 = vadd.f32 %v129_v10, %v41_v9  ;;  %v203_v12 = vpop.f32.mrb[1].mxu0 }
 0x10f   :  { %v133_v13 = vsub.f32 0.0, %v130_v11 }
 0x111   :  { %v135_v14 = vrot.slane %v133_v13, 6 }
 0x113   :  { %v138_v15 = vsel %vm137_vm3, %v130_v11, %v135_v14 }
 0x114   :  { %v140_v16 = vsel %vm139_vm4, %v138_v15, -inf }
 0x115   :  { %141 = vmax.xlane.f32.xlu0 %v140_v16 }
 0x1a2   :  { %v142_v17 = vpop.xlane.xlu0 %141 }
 0x1a3   :  { %v143_v18 = vsel %vm137_vm3, %v142_v17, -inf  ;;  %v151_v19 = vsel %vm150_vm5, %v142_v17, -inf }
 0x1a4   :  { %v144_v20 = vrot.slane %v143_v18, 4  ;;  %v152_v21 = vrot.slane %v151_v19, 4 }
 0x1a6   :  { %v145_v22 = vmax.f32 %v143_v18, %v144_v20  ;;  %v153_v23 = vmax.f32 %v151_v19, %v152_v21 }
 0x1a8   :  { %v146_v24 = vrot.slane %v145_v22, 2  ;;  %v154_v25 = vrot.slane %v153_v23, 2 }
 0x1aa   :  { %v147_v26 = vmax.f32 %v145_v22, %v146_v24  ;;  %v155_v27 = vmax.f32 %v153_v23, %v154_v25 }
 0x1ac   :  { %v148_v28 = vrot.slane %v147_v26, 1  ;;  %v156_v29 = vrot.slane %v155_v27, 1 }
 0x1ae   :  { %v157_v30 = vmax.f32 %v155_v27, %v156_v29  ;;  %v149_v31 = vmax.f32 %v147_v26, %v148_v28 }
 0x1b0   :  { %v158_v32 = vsub.f32 0.0, %v157_v30 }
 0x1b2   :  { %v159_v33 = vsub.f32 %v149_v31, %v158_v32  ;;  %v163_v35 = vsub.f32 %v130_v11, %v158_v32 }
 0x1b4   :  { %v160_v34 = vadd.f32 1e-09, %v159_v33 }
 0x1b6   :  { %220 = vrcp.f32 %v160_v34 }
 0x1c0   :  { %v221_v36 = vpop.eup %220 }
 0x1c1   :  { %v164_v37 = vmul.f32 %v221_v36, %v163_v35 }
 0x1c3   :  { %166 = vst.msk [vmem:[#allocation7] sm:$0x3] %vm165_vm6, %v164_v37 }
 0x1c4   :  { %277 = shalt.err (!%p274_p6)
}
 0x1c5   :  { %s278_s15 = scalar_lea.hbm %s371_s3, 32 }
 0x1c6   :  { %p279_p7 = scmp.ne.s32.totalorder %s371_s3, %s278_s15  ;;  %p282_p8 = scmp.lt.u32.totalorder %s278_s15, %s371_s3 }
 0x1c8   :  { %p284_p9 = pnand %p282_p8, %p279_p7 }
 0x1ca   :  { %287 = shalt.err (!%p284_p9)
}
 0x1cb   :  { %176 = dma.vmem_to_hbm [thread:$0]  %s174_s11, 32, %s371_s3, [#allocation4]  }
 0x1cc   :  { %292 = dma.done.wait [#allocation4], 32  }
 0x1cd   :  { %293 = vsyncadd [#allocation4], 4294967264 }
 0x1ce   :  { %180 = vsyncpa [#allocation3], 1 }
 0x1cf   :  { %181 = vsyncpa [#allocation6], 1 }
 0x1d0   :  { %182 = vsyncpa [#allocation4], 1 }

</bundles_post_ra>
